<compile_context>
chip_gen: v5e
topology: v5e:2x2
jax: 0.10.0
libtpu: 0.0.40
codegen_flags: <defaults>
</compile_context>

<pallas_src>
import jax
import jax.numpy as jnp
from jax import lax
from jax.experimental import pallas as pl
from jax.experimental.pallas import tpu as pltpu


def _patch_shuffle_kernel(idx_ref, x_ref, o_ref):
    """Vectorized per-batch gather via one-hot MXU matmul.

    idx_ref : VMEM (block_b, remain_T, 1) int32   selected source rows
    x_ref   : VMEM (block_b, T, C)                input patches (batch-major)
    o_ref   : VMEM (block_b, remain_T, C)         gathered patches
    """
    block_b, t, _c = x_ref.shape
    remain_t = o_ref.shape[1]

    # Hoisted out of the loop (broadcast_in_dim is not CSE'd by JAX).
    iota_t = lax.broadcasted_iota(jnp.int32, (remain_t, t), 1)

    # Static unroll over the (small) batch sub-block; each iteration is one
    # full-tile MXU matmul instead of remain_T single-sublane copies.
    for b in range(block_b):
        onehot = (idx_ref[b] == iota_t).astype(x_ref.dtype)        # (remain_T, T)
        o_ref[b] = jnp.dot(
            onehot, x_ref[b], preferred_element_type=jnp.float32
        ).astype(o_ref.dtype)                                      # (remain_T, C)


_BLOCK_B_CAP = 32  # cap the static unroll length inside the kernel


def _pick_block_b(B, T, C, remain_t, dtype, vmem_budget_bytes):
    """Largest divisor of B whose double-buffered blocks fit the VMEM budget."""
    itemsize = jnp.dtype(dtype).itemsize
    idx_rows = -(-remain_t // 8) * 8  # sublane padding of the (remain_t, 1) idx tile

    def step_bytes(bb):
        data = bb * (T * C + remain_t * C) * itemsize
        idx = bb * idx_rows * 128 * 4  # int32 idx tile pads to 128 lanes
        return 2 * (data + idx)        # double-buffered by the Pallas pipeline

    divisors = [d for d in range(1, B + 1) if B % d == 0]
    feasible = [d for d in divisors
                if d <= _BLOCK_B_CAP and step_bytes(d) <= vmem_budget_bytes]
    if not feasible:
        return 1
    bb = max(feasible)
    if bb == B and B > 1:
        # Prefer >= 2 grid steps so pipelining / megacore sharding has work.
        smaller = [d for d in feasible if d < B]
        if smaller:
            bb = max(smaller)
    return bb


def patch_shuffle_gather(patches_btc, fwd_idx_bt, remain_t, *, block_b=None,
                         vmem_budget_bytes=24 << 20):
    """Gather `remain_t` rows per batch: (B, T, C), (B, >=remain_t) -> (B, remain_t, C)."""
    B, T, C = patches_btc.shape
    if not (0 < remain_t <= T):
        raise ValueError(f"remain_t={remain_t} must be in (0, T={T}]")

    # Slice the index table to only the rows we keep; present it as
    # (B, remain_t, 1) so per-batch indices land on the sublane axis, ready
    # for a cheap lane-broadcast compare against iota inside the kernel.
    idx = fwd_idx_bt[:, :remain_t].astype(jnp.int32).reshape(B, remain_t, 1)

    if block_b is None:
        block_b = _pick_block_b(B, T, C, remain_t, patches_btc.dtype,
                                vmem_budget_bytes)
    if B % block_b != 0:
        raise ValueError(f"block_b={block_b} must divide B={B}")

    itemsize = jnp.dtype(patches_btc.dtype).itemsize
    step_fp = 2 * (block_b * (T * C + remain_t * C) * itemsize
                   + block_b * (-(-remain_t // 8) * 8) * 128 * 4)
    # Explicit scoped-VMEM request; capped at 48 MiB so it is safe on v7x
    # (64 MiB physical) while letting v5e/v6e take larger blocks.
    vmem_limit = int(min(48 << 20, max(32 << 20, 2 * step_fp)))

    grid = (B // block_b,)
    return pl.pallas_call(
        _patch_shuffle_kernel,
        out_shape=jax.ShapeDtypeStruct((B, remain_t, C), patches_btc.dtype),
        grid_spec=pltpu.PrefetchScalarGridSpec(
            num_scalar_prefetch=0,
            grid=grid,
            in_specs=[
                pl.BlockSpec((block_b, remain_t, 1), lambda b: (b, 0, 0)),
                pl.BlockSpec((block_b, T, C), lambda b: (b, 0, 0)),
            ],
            out_specs=pl.BlockSpec((block_b, remain_t, C), lambda b: (b, 0, 0)),
        ),
        compiler_params=pltpu.CompilerParams(
            dimension_semantics=("parallel",),
            vmem_limit_bytes=vmem_limit,
        ),
    )(idx, patches_btc)


def patch_shuffle_btc(patches_btc, key, ratio, *, block_b=None):
    """Batch-major PatchShuffle: (B, T, C) -> ((B, remain_T, C), (B, T), (B, T)).

    Preferred entry point: callers that keep activations batch-major avoid
    the two full HBM transposes of the (T, B, C) interface entirely.
    """
    B, T, _C = patches_btc.shape
    remain_T = int(T * (1.0 - ratio))  # matches PyTorch int(T * (1 - ratio))

    keys = jax.random.split(key, B)
    fwd_bt = jax.vmap(lambda k: jax.random.permutation(k, T))(keys).astype(jnp.int32)
    bwd_bt = jnp.argsort(fwd_bt, axis=-1).astype(jnp.int32)

    shuffled_btc = patch_shuffle_gather(patches_btc, fwd_bt, remain_T,
                                        block_b=block_b)
    return shuffled_btc, fwd_bt, bwd_bt


def patch_shuffle(patches_tbc, key, ratio, *, block_b=None):
    """PyTorch-compatible PatchShuffle.forward on (T, B, C).

    Returns (patches_shuffled (remain_T, B, C), forward_indexes (T, B),
             backward_indexes (T, B)).

    NOTE: the two transposes below are full HBM read+writes; keep activations
    in (B, T, C) upstream and call `patch_shuffle_btc` directly to avoid them.
    """
    patches_btc = jnp.transpose(patches_tbc, (1, 0, 2))          # (B, T, C)
    shuffled_btc, fwd_bt, bwd_bt = patch_shuffle_btc(
        patches_btc, key, ratio, block_b=block_b)
    shuffled_tbc = jnp.transpose(shuffled_btc, (1, 0, 2))        # (remain_T, B, C)
    return shuffled_tbc, fwd_bt.T, bwd_bt.T


if __name__ == "__main__":
    key = jax.random.PRNGKey(0)
    k_data, k_perm = jax.random.split(key)

    # Small but TPU-friendly shapes: C=128 keeps output stores lane-dense.
    T, B, C = 16, 16, 128
    ratio = 0.75
    patches = jax.random.normal(k_data, (T, B, C), dtype=jnp.float32)

    out, fwd, bwd = patch_shuffle(patches, k_perm, ratio)
    out = jax.block_until_ready(out)

    remain_T = int(T * (1 - ratio))
    assert out.shape == (remain_T, B, C)
    assert fwd.shape == (T, B) and bwd.shape == (T, B)

    # Reference: plain JAX gather, same semantics as torch.gather(dim=0).
    ref = jnp.take_along_axis(
        patches, fwd[:, :, None].astype(jnp.int32), axis=0)[:remain_T]
    assert jnp.allclose(out, ref, rtol=1e-5, atol=1e-5), "gather mismatch"

    # backward_indexes inverts forward_indexes per batch column.
    assert jnp.all(jnp.take_along_axis(fwd, bwd, axis=0) ==
                   jnp.arange(T)[:, None])

    print("KERNEL_OK")
</pallas_src>

<mosaic_0001>
module attributes {stable_mosaic.version = 11 : i64} {
  func.func @_patch_shuffle_kernel(%arg0: i32, %arg1: memref<8x4x1xi32, #tpu.memory_space<vmem>>, %arg2: memref<8x16x128xf32, #tpu.memory_space<vmem>>, %arg3: memref<8x4x128xf32, #tpu.memory_space<vmem>>) attributes {dimension_semantics = [#tpu.dimension_semantics<parallel>], iteration_bounds = array<i64: 2>, scalar_prefetch = 0 : i64, scratch_operands = 0 : i64, tpu.core_type = #tpu.core_type<tc>, window_params = [{transform_indices = @transform_0, window_bounds = array<i64: 8, 4, 1>}, {transform_indices = @transform_1, window_bounds = array<i64: 8, 16, 128>}, {transform_indices = @transform_2, window_bounds = array<i64: 8, 4, 128>}]} {
    %0 = tpu.iota {dimensions = array<i32: 1>} : vector<4x16xi32>
    %c0 = arith.constant 0 : index
    %c0_0 = arith.constant 0 : index
    %c0_1 = arith.constant 0 : index
    %1 = vector.load %arg1[%c0, %c0_0, %c0_1] : memref<8x4x1xi32, #tpu.memory_space<vmem>>, vector<1x4x1xi32>
    %2 = vector.shape_cast %1 : vector<1x4x1xi32> to vector<4x1xi32>
    %3 = vector.broadcast %2 : vector<4x1xi32> to vector<4x16xi32>
    %4 = arith.cmpi eq, %3, %0 : vector<4x16xi32>
    %5 = arith.extui %4 : vector<4x16xi1> to vector<4x16xi32>
    %6 = arith.sitofp %5 : vector<4x16xi32> to vector<4x16xf32>
    %c0_2 = arith.constant 0 : index
    %c0_3 = arith.constant 0 : index
    %c0_4 = arith.constant 0 : index
    %7 = vector.load %arg2[%c0_2, %c0_3, %c0_4] : memref<8x16x128xf32, #tpu.memory_space<vmem>>, vector<1x16x128xf32>
    %8 = vector.shape_cast %7 : vector<1x16x128xf32> to vector<16x128xf32>
    %cst = arith.constant dense<0.000000e+00> : vector<4x128xf32>
    %9 = tpu.matmul %6, %8, %cst {dimension_numbers = #tpu.dot_dimension_numbers<[1], [0], [0], [1], [0, 0, 1, 1], [], []>} : vector<4x16xf32>, vector<16x128xf32>, vector<4x128xf32> -> vector<4x128xf32>
    %c0_5 = arith.constant 0 : index
    %c0_6 = arith.constant 0 : index
    %c0_7 = arith.constant 0 : index
    %10 = vector.load %arg3[%c0_5, %c0_6, %c0_7] : memref<8x4x128xf32, #tpu.memory_space<vmem>>, vector<1x4x128xf32>
    %11 = vector.shape_cast %10 : vector<1x4x128xf32> to vector<4x128xf32>
    %12 = vector.shape_cast %9 : vector<4x128xf32> to vector<1x4x128xf32>
    tpu.vector_store %arg3[%c0_5, %c0_6, %c0_7], %12 {strides = array<i32>} : memref<8x4x128xf32, #tpu.memory_space<vmem>>, vector<1x4x128xf32>,
    %c1 = arith.constant 1 : index
    %c0_8 = arith.constant 0 : index
    %c0_9 = arith.constant 0 : index
    %13 = vector.load %arg1[%c1, %c0_8, %c0_9] : memref<8x4x1xi32, #tpu.memory_space<vmem>>, vector<1x4x1xi32>
    %14 = vector.shape_cast %13 : vector<1x4x1xi32> to vector<4x1xi32>
    %15 = vector.broadcast %14 : vector<4x1xi32> to vector<4x16xi32>
    %16 = arith.cmpi eq, %15, %0 : vector<4x16xi32>
    %17 = arith.extui %16 : vector<4x16xi1> to vector<4x16xi32>
    %18 = arith.sitofp %17 : vector<4x16xi32> to vector<4x16xf32>
    %c1_10 = arith.constant 1 : index
    %c0_11 = arith.constant 0 : index
    %c0_12 = arith.constant 0 : index
    %19 = vector.load %arg2[%c1_10, %c0_11, %c0_12] : memref<8x16x128xf32, #tpu.memory_space<vmem>>, vector<1x16x128xf32>
    %20 = vector.shape_cast %19 : vector<1x16x128xf32> to vector<16x128xf32>
    %cst_13 = arith.constant dense<0.000000e+00> : vector<4x128xf32>
    %21 = tpu.matmul %18, %20, %cst_13 {dimension_numbers = #tpu.dot_dimension_numbers<[1], [0], [0], [1], [0, 0, 1, 1], [], []>} : vector<4x16xf32>, vector<16x128xf32>, vector<4x128xf32> -> vector<4x128xf32>
    %c1_14 = arith.constant 1 : index
    %c0_15 = arith.constant 0 : index
    %c0_16 = arith.constant 0 : index
    %22 = vector.load %arg3[%c1_14, %c0_15, %c0_16] : memref<8x4x128xf32, #tpu.memory_space<vmem>>, vector<1x4x128xf32>
    %23 = vector.shape_cast %22 : vector<1x4x128xf32> to vector<4x128xf32>
    %24 = vector.shape_cast %21 : vector<4x128xf32> to vector<1x4x128xf32>
    tpu.vector_store %arg3[%c1_14, %c0_15, %c0_16], %24 {strides = array<i32>} : memref<8x4x128xf32, #tpu.memory_space<vmem>>, vector<1x4x128xf32>,
    %c2 = arith.constant 2 : index
    %c0_17 = arith.constant 0 : index
    %c0_18 = arith.constant 0 : index
    %25 = vector.load %arg1[%c2, %c0_17, %c0_18] : memref<8x4x1xi32, #tpu.memory_space<vmem>>, vector<1x4x1xi32>
    %26 = vector.shape_cast %25 : vector<1x4x1xi32> to vector<4x1xi32>
    %27 = vector.broadcast %26 : vector<4x1xi32> to vector<4x16xi32>
    %28 = arith.cmpi eq, %27, %0 : vector<4x16xi32>
    %29 = arith.extui %28 : vector<4x16xi1> to vector<4x16xi32>
    %30 = arith.sitofp %29 : vector<4x16xi32> to vector<4x16xf32>
    %c2_19 = arith.constant 2 : index
    %c0_20 = arith.constant 0 : index
    %c0_21 = arith.constant 0 : index
    %31 = vector.load %arg2[%c2_19, %c0_20, %c0_21] : memref<8x16x128xf32, #tpu.memory_space<vmem>>, vector<1x16x128xf32>
    %32 = vector.shape_cast %31 : vector<1x16x128xf32> to vector<16x128xf32>
    %cst_22 = arith.constant dense<0.000000e+00> : vector<4x128xf32>
    %33 = tpu.matmul %30, %32, %cst_22 {dimension_numbers = #tpu.dot_dimension_numbers<[1], [0], [0], [1], [0, 0, 1, 1], [], []>} : vector<4x16xf32>, vector<16x128xf32>, vector<4x128xf32> -> vector<4x128xf32>
    %c2_23 = arith.constant 2 : index
    %c0_24 = arith.constant 0 : index
    %c0_25 = arith.constant 0 : index
    %34 = vector.load %arg3[%c2_23, %c0_24, %c0_25] : memref<8x4x128xf32, #tpu.memory_space<vmem>>, vector<1x4x128xf32>
    %35 = vector.shape_cast %34 : vector<1x4x128xf32> to vector<4x128xf32>
    %36 = vector.shape_cast %33 : vector<4x128xf32> to vector<1x4x128xf32>
    tpu.vector_store %arg3[%c2_23, %c0_24, %c0_25], %36 {strides = array<i32>} : memref<8x4x128xf32, #tpu.memory_space<vmem>>, vector<1x4x128xf32>,
    %c3 = arith.constant 3 : index
    %c0_26 = arith.constant 0 : index
    %c0_27 = arith.constant 0 : index
    %37 = vector.load %arg1[%c3, %c0_26, %c0_27] : memref<8x4x1xi32, #tpu.memory_space<vmem>>, vector<1x4x1xi32>
    %38 = vector.shape_cast %37 : vector<1x4x1xi32> to vector<4x1xi32>
    %39 = vector.broadcast %38 : vector<4x1xi32> to vector<4x16xi32>
    %40 = arith.cmpi eq, %39, %0 : vector<4x16xi32>
    %41 = arith.extui %40 : vector<4x16xi1> to vector<4x16xi32>
    %42 = arith.sitofp %41 : vector<4x16xi32> to vector<4x16xf32>
    %c3_28 = arith.constant 3 : index
    %c0_29 = arith.constant 0 : index
    %c0_30 = arith.constant 0 : index
    %43 = vector.load %arg2[%c3_28, %c0_29, %c0_30] : memref<8x16x128xf32, #tpu.memory_space<vmem>>, vector<1x16x128xf32>
    %44 = vector.shape_cast %43 : vector<1x16x128xf32> to vector<16x128xf32>
    %cst_31 = arith.constant dense<0.000000e+00> : vector<4x128xf32>
    %45 = tpu.matmul %42, %44, %cst_31 {dimension_numbers = #tpu.dot_dimension_numbers<[1], [0], [0], [1], [0, 0, 1, 1], [], []>} : vector<4x16xf32>, vector<16x128xf32>, vector<4x128xf32> -> vector<4x128xf32>
    %c3_32 = arith.constant 3 : index
    %c0_33 = arith.constant 0 : index
    %c0_34 = arith.constant 0 : index
    %46 = vector.load %arg3[%c3_32, %c0_33, %c0_34] : memref<8x4x128xf32, #tpu.memory_space<vmem>>, vector<1x4x128xf32>
    %47 = vector.shape_cast %46 : vector<1x4x128xf32> to vector<4x128xf32>
    %48 = vector.shape_cast %45 : vector<4x128xf32> to vector<1x4x128xf32>
    tpu.vector_store %arg3[%c3_32, %c0_33, %c0_34], %48 {strides = array<i32>} : memref<8x4x128xf32, #tpu.memory_space<vmem>>, vector<1x4x128xf32>,
    %c4 = arith.constant 4 : index
    %c0_35 = arith.constant 0 : index
    %c0_36 = arith.constant 0 : index
    %49 = vector.load %arg1[%c4, %c0_35, %c0_36] : memref<8x4x1xi32, #tpu.memory_space<vmem>>, vector<1x4x1xi32>
    %50 = vector.shape_cast %49 : vector<1x4x1xi32> to vector<4x1xi32>
    %51 = vector.broadcast %50 : vector<4x1xi32> to vector<4x16xi32>
    %52 = arith.cmpi eq, %51, %0 : vector<4x16xi32>
    %53 = arith.extui %52 : vector<4x16xi1> to vector<4x16xi32>
    %54 = arith.sitofp %53 : vector<4x16xi32> to vector<4x16xf32>
    %c4_37 = arith.constant 4 : index
    %c0_38 = arith.constant 0 : index
    %c0_39 = arith.constant 0 : index
    %55 = vector.load %arg2[%c4_37, %c0_38, %c0_39] : memref<8x16x128xf32, #tpu.memory_space<vmem>>, vector<1x16x128xf32>
    %56 = vector.shape_cast %55 : vector<1x16x128xf32> to vector<16x128xf32>
    %cst_40 = arith.constant dense<0.000000e+00> : vector<4x128xf32>
    %57 = tpu.matmul %54, %56, %cst_40 {dimension_numbers = #tpu.dot_dimension_numbers<[1], [0], [0], [1], [0, 0, 1, 1], [], []>} : vector<4x16xf32>, vector<16x128xf32>, vector<4x128xf32> -> vector<4x128xf32>
    %c4_41 = arith.constant 4 : index
    %c0_42 = arith.constant 0 : index
    %c0_43 = arith.constant 0 : index
    %58 = vector.load %arg3[%c4_41, %c0_42, %c0_43] : memref<8x4x128xf32, #tpu.memory_space<vmem>>, vector<1x4x128xf32>
    %59 = vector.shape_cast %58 : vector<1x4x128xf32> to vector<4x128xf32>
    %60 = vector.shape_cast %57 : vector<4x128xf32> to vector<1x4x128xf32>
    tpu.vector_store %arg3[%c4_41, %c0_42, %c0_43], %60 {strides = array<i32>} : memref<8x4x128xf32, #tpu.memory_space<vmem>>, vector<1x4x128xf32>,
    %c5 = arith.constant 5 : index
    %c0_44 = arith.constant 0 : index
    %c0_45 = arith.constant 0 : index
    %61 = vector.load %arg1[%c5, %c0_44, %c0_45] : memref<8x4x1xi32, #tpu.memory_space<vmem>>, vector<1x4x1xi32>
    %62 = vector.shape_cast %61 : vector<1x4x1xi32> to vector<4x1xi32>
    %63 = vector.broadcast %62 : vector<4x1xi32> to vector<4x16xi32>
    %64 = arith.cmpi eq, %63, %0 : vector<4x16xi32>
    %65 = arith.extui %64 : vector<4x16xi1> to vector<4x16xi32>
    %66 = arith.sitofp %65 : vector<4x16xi32> to vector<4x16xf32>
    %c5_46 = arith.constant 5 : index
    %c0_47 = arith.constant 0 : index
    %c0_48 = arith.constant 0 : index
    %67 = vector.load %arg2[%c5_46, %c0_47, %c0_48] : memref<8x16x128xf32, #tpu.memory_space<vmem>>, vector<1x16x128xf32>
    %68 = vector.shape_cast %67 : vector<1x16x128xf32> to vector<16x128xf32>
    %cst_49 = arith.constant dense<0.000000e+00> : vector<4x128xf32>
    %69 = tpu.matmul %66, %68, %cst_49 {dimension_numbers = #tpu.dot_dimension_numbers<[1], [0], [0], [1], [0, 0, 1, 1], [], []>} : vector<4x16xf32>, vector<16x128xf32>, vector<4x128xf32> -> vector<4x128xf32>
    %c5_50 = arith.constant 5 : index
    %c0_51 = arith.constant 0 : index
    %c0_52 = arith.constant 0 : index
    %70 = vector.load %arg3[%c5_50, %c0_51, %c0_52] : memref<8x4x128xf32, #tpu.memory_space<vmem>>, vector<1x4x128xf32>
    %71 = vector.shape_cast %70 : vector<1x4x128xf32> to vector<4x128xf32>
    %72 = vector.shape_cast %69 : vector<4x128xf32> to vector<1x4x128xf32>
    tpu.vector_store %arg3[%c5_50, %c0_51, %c0_52], %72 {strides = array<i32>} : memref<8x4x128xf32, #tpu.memory_space<vmem>>, vector<1x4x128xf32>,
    %c6 = arith.constant 6 : index
    %c0_53 = arith.constant 0 : index
    %c0_54 = arith.constant 0 : index
    %73 = vector.load %arg1[%c6, %c0_53, %c0_54] : memref<8x4x1xi32, #tpu.memory_space<vmem>>, vector<1x4x1xi32>
    %74 = vector.shape_cast %73 : vector<1x4x1xi32> to vector<4x1xi32>
    %75 = vector.broadcast %74 : vector<4x1xi32> to vector<4x16xi32>
    %76 = arith.cmpi eq, %75, %0 : vector<4x16xi32>
    %77 = arith.extui %76 : vector<4x16xi1> to vector<4x16xi32>
    %78 = arith.sitofp %77 : vector<4x16xi32> to vector<4x16xf32>
    %c6_55 = arith.constant 6 : index
    %c0_56 = arith.constant 0 : index
    %c0_57 = arith.constant 0 : index
    %79 = vector.load %arg2[%c6_55, %c0_56, %c0_57] : memref<8x16x128xf32, #tpu.memory_space<vmem>>, vector<1x16x128xf32>
    %80 = vector.shape_cast %79 : vector<1x16x128xf32> to vector<16x128xf32>
    %cst_58 = arith.constant dense<0.000000e+00> : vector<4x128xf32>
    %81 = tpu.matmul %78, %80, %cst_58 {dimension_numbers = #tpu.dot_dimension_numbers<[1], [0], [0], [1], [0, 0, 1, 1], [], []>} : vector<4x16xf32>, vector<16x128xf32>, vector<4x128xf32> -> vector<4x128xf32>
    %c6_59 = arith.constant 6 : index
    %c0_60 = arith.constant 0 : index
    %c0_61 = arith.constant 0 : index
    %82 = vector.load %arg3[%c6_59, %c0_60, %c0_61] : memref<8x4x128xf32, #tpu.memory_space<vmem>>, vector<1x4x128xf32>
    %83 = vector.shape_cast %82 : vector<1x4x128xf32> to vector<4x128xf32>
    %84 = vector.shape_cast %81 : vector<4x128xf32> to vector<1x4x128xf32>
    tpu.vector_store %arg3[%c6_59, %c0_60, %c0_61], %84 {strides = array<i32>} : memref<8x4x128xf32, #tpu.memory_space<vmem>>, vector<1x4x128xf32>,
    %c7 = arith.constant 7 : index
    %c0_62 = arith.constant 0 : index
    %c0_63 = arith.constant 0 : index
    %85 = vector.load %arg1[%c7, %c0_62, %c0_63] : memref<8x4x1xi32, #tpu.memory_space<vmem>>, vector<1x4x1xi32>
    %86 = vector.shape_cast %85 : vector<1x4x1xi32> to vector<4x1xi32>
    %87 = vector.broadcast %86 : vector<4x1xi32> to vector<4x16xi32>
    %88 = arith.cmpi eq, %87, %0 : vector<4x16xi32>
    %89 = arith.extui %88 : vector<4x16xi1> to vector<4x16xi32>
    %90 = arith.sitofp %89 : vector<4x16xi32> to vector<4x16xf32>
    %c7_64 = arith.constant 7 : index
    %c0_65 = arith.constant 0 : index
    %c0_66 = arith.constant 0 : index
    %91 = vector.load %arg2[%c7_64, %c0_65, %c0_66] : memref<8x16x128xf32, #tpu.memory_space<vmem>>, vector<1x16x128xf32>
    %92 = vector.shape_cast %91 : vector<1x16x128xf32> to vector<16x128xf32>
    %cst_67 = arith.constant dense<0.000000e+00> : vector<4x128xf32>
    %93 = tpu.matmul %90, %92, %cst_67 {dimension_numbers = #tpu.dot_dimension_numbers<[1], [0], [0], [1], [0, 0, 1, 1], [], []>} : vector<4x16xf32>, vector<16x128xf32>, vector<4x128xf32> -> vector<4x128xf32>
    %c7_68 = arith.constant 7 : index
    %c0_69 = arith.constant 0 : index
    %c0_70 = arith.constant 0 : index
    %94 = vector.load %arg3[%c7_68, %c0_69, %c0_70] : memref<8x4x128xf32, #tpu.memory_space<vmem>>, vector<1x4x128xf32>
    %95 = vector.shape_cast %94 : vector<1x4x128xf32> to vector<4x128xf32>
    %96 = vector.shape_cast %93 : vector<4x128xf32> to vector<1x4x128xf32>
    tpu.vector_store %arg3[%c7_68, %c0_69, %c0_70], %96 {strides = array<i32>} : memref<8x4x128xf32, #tpu.memory_space<vmem>>, vector<1x4x128xf32>,
    return
  }
  func.func @transform_0(%arg0: i32) -> (i32, i32, i32) {
    %c0_i32 = arith.constant 0 : i32
    %c0_i32_0 = arith.constant 0 : i32
    %c0_i32_1 = arith.constant 0 : i32
    return %arg0, %c0_i32, %c0_i32_0 : i32, i32, i32
  }
  func.func @transform_1(%arg0: i32) -> (i32, i32, i32) {
    %c0_i32 = arith.constant 0 : i32
    %c0_i32_0 = arith.constant 0 : i32
    %c0_i32_1 = arith.constant 0 : i32
    return %arg0, %c0_i32, %c0_i32_0 : i32, i32, i32
  }
  func.func @transform_2(%arg0: i32) -> (i32, i32, i32) {
    %c0_i32 = arith.constant 0 : i32
    %c0_i32_0 = arith.constant 0 : i32
    %c0_i32_1 = arith.constant 0 : i32
    return %arg0, %c0_i32, %c0_i32_0 : i32, i32, i32
  }
}

</mosaic_0001>

<bundles_post_ra>
// kernel: tpu_custom_call.1
= control target key start
LH: loop header
LB: loop body
LE: loop exit
PB: predicated region body
PF: predicated region fallthrough
CT: control target
= control target key end

     0   :  { %7 = vsyncpa [#allocation3], 0  ;;  %s974_s0 = inlined_call_operand.vmem [shape: s32[16,4,1], index: 0, kind: input, shape index: {}]   ;;  %s975_s1 = inlined_call_operand.hbm [shape: f32[16,16,128], index: 1, kind: input, shape index: {}]   ;;  %s976_s2 = inlined_call_operand.hbm [shape: f32[16,4,128], index: 2, kind: output, shape index: {}]  }
   0x1   :  { %9 = vsyncpa [#allocation3 + $0x1], 0 }
   0x2   :  { %10 = vsyncpa [#allocation4], 0 }
   0x3   :  { %12 = vsyncpa [#allocation4 + $0x1], 0  ;;  %s816_s9 = smov 0   ;;  %s818_s10 = smov 0  }
   0x4   :  { %s820_s11 = smov 0   ;;  %s822_s12 = smov 0  }
   0x5 LB: > { %s837_s13 = sadd.s32 4294967295, %s793_s12   ;;  %s578_s14 = sadd.s32 4294967294, %s793_s12   ;;  %s793_s12 = sphi %s822_s12, %s986_s12   ;;  %s789_s11 = sphi %s820_s11, %s985_s11   ;;  %s785_s10 = sphi %s818_s10, %s984_s10   ;;  %s781_s9 = sphi %s816_s9, %s983_s9  }
   0x6   : > { %s841_s15 = sadd.s32 1, %s793_s12   ;;  %s51_s16 = sadd.s32 1, %s789_s11 }
   0x7   : > { %s48_s17 = ssub.s32 %s793_s12, %s841_s15  ;;  %p58_p0 = scmp.ne.s32.totalorder %s789_s11, %s785_s10 }
   0x8   : > { %p49_p1 = scmp.eq.s32.totalorder %s48_s17, 0  ;;  %p59_p2 = scmp.eq.s32.totalorder %s793_s12, 0 }
   0x9   : > { %p64_p3 = scmp.ne.s32.totalorder %s785_s10, %s781_s9  ;;  %p65_p4 = scmp.eq.s32.totalorder %s837_s13, 0 }
   0xa   : > { %s853_s18 = scalar_select %p49_p1, %s789_s11, %s51_s16  }
   0xb   : > { %p855_p5 = por %p59_p2, %p58_p0  ;;  %p859_p6 = por %p65_p4, %p64_p3 }
   0xc   : > { %p88_p7 = scmp.eq.s32.totalorder %s837_s13, 1  ;;  %p94_p8 = scmp.eq.s32.totalorder %s578_s14, 1 }
   0xd   : > { %p654_p10 = scmp.lt.s32.totalorder %s793_s12, 2  ;;  %s123_s23 = sand.u32 1, %s789_s11  }
   0xe   : > { %p866_p11 = por %p88_p7, %p58_p0  ;;  %p870_p12 = por %p94_p8, %p64_p3 }
   0xf   : > { %s640_s24 = sshll.u32 %s793_s12, 7  ;;  %s581_s25 = sshll.u32 %s123_s23, 7 }
  0x10   : > { %s133_s28 = scalar_lea.hbm %s975_s1, %s640_s24  ;;  %s127_s30 = scalar_lea.vmem [#allocation2], %s581_s25 }
  0x11   : > { %s134_s29 = sshll.u32 %s133_s28, 4  ;;  %s136_s3 = sshll.u32 %s127_s30, 4  ;;  %s135_s29 = int_to_ptr.hbm [resolvable:$true] %s134_s29  ;;  %s137_s3 = int_to_ptr.vmem [resolvable:$true] %s136_s3 }
  0x12   : > { %p881_p13 = pnand %p654_p10, %p855_p5  ;;  %p585_p0 = scmp.ge.s32.totalorder %s793_s12, 1 }
  0x13   : > { %p144_p1 = scmp.lt.s32.totalorder %s793_s12, 3  ;;  %s124_s5 = scalar_lea.sflag [#allocation3], %s123_s23 }
  0x14   : > { %s697_s6 = sshra.s32 %s135_s29, 4  ;;  %p701_p3 = pneg %p881_p13  ;;  %s698_s6 = int_to_ptr.hbm [resolvable:$true] %s697_s6 }
  0x15   : > { %s699_s7 = scalar_lea.hbm %s698_s6, 128  ;;  %s704_s16 = scalar_lea.hbm %s975_s1, 256 }
  0x16   : > { %p700_p2 = scmp.ne.s32.totalorder %s698_s6, %s699_s7  ;;  %p705_p5 = scmp.lt.s32.totalorder %s698_s6, %s975_s1 }
  0x17   : > { %p706_p8 = scmp.lt.s32.totalorder %s704_s16, %s699_s7 }
  0x18   : > { %p702_p4 = pnand %p701_p3, %p700_p2 }
  0x19   : > { %p707_p10 = por %p706_p8, %p705_p5 }
  0x1a   : > { %p703_p7 = pneg %p702_p4 }
  0x1c   : > { %p708_p9 = pnand %p707_p10, %p703_p7 }
  0x1e   : > { %711 = shalt.err (!%p708_p9)
}
  0x1f   : > { %s795_s23 = smov 128   ;;  %s796_s24 = smov 8  }
  0x20   : > { %649 = dma.hbm_to_vmem [thread:$0]  (!%p881_p13), %s135_s29, 2048, %s137_s3, %s124_s5, %s795_s23, %s795_s23, %s796_s24  }
  0x21   : > { %p145_p2 = pnand %p585_p0, %p144_p1 }
  0x22   : > { %s902_s25 = sand.u32 (!%p145_p2), 1, %s785_s10  }
  0x23   : > { %148 = sbr.rel (%p145_p2) target bundleno = 318 (0x13e), region = 28  ;;  %s586_s26 = sshll.u32 (!%p145_p2), %s902_s25, 7 }
  0x24   : > { %s151_s27 = scalar_lea.sflag (!%p145_p2), [#allocation3], %s902_s25  ;;  %s906_s28 = scalar_lea.vmem (!%p145_p2), [#allocation2], %s586_s26 }
  0x28   : > { %772 = dma.done.wait (%p859_p6), %s151_s27, 2048  }
  0x29   : > { %774 = vsyncadd (%p859_p6), %s151_s27, 4294965248  ;;  %s588_s29 = sshll.u32 %s837_s13, 3  ;;  %v797_v0 = vmov 0   ;;  %v601_v9 = vld [vmem:[%s906_s28 + $0x28] sm:$0xff]  ;;  %v600_v10 = vld [vmem:[%s906_s28 + $0x20] sm:$0xff]  ;;  %v189_v25 = vlaneseq  ;;  %vm200_vm0 = vcmask 130048  }
  0x2a   : > { %695 = vset.pattern.permute.xlu1 %v797_v0  ;;  %694 = vset.pattern.permute.xlu0 %v797_v0  ;;  %p182_p9 = scmp.lt.s32.totalorder %s588_s29, 15  ;;  %v199_v11 = vld [vmem:[%s906_s28 + $0x8] sm:$0xff]  ;;  %v607_v12 = vld [vmem:[%s906_s28 + $0x38] sm:$0xff]  ;;  %v198_v14 = vld [vmem:[%s906_s28] sm:$0xff]  ;;  %v798_v29 = vmov 0.0   ;;  %s587_s20 = sshll.u32 %s902_s25, 5 }
  0x2b   : > { %696 = vset.pattern.permute.xlu2 %v797_v0  ;;  %289 = vmatpush.msra.mxu2 %v601_v9  ;;  %v625_v13 = vld [vmem:[%s906_s28 + $0x68] sm:$0xff]  ;;  %v595_v15 = vld [vmem:[%s906_s28 + $0x18] sm:$0xff]  ;;  %v594_v16 = vld [vmem:[%s906_s28 + $0x10] sm:$0xff]  ;;  %v190_v26 = vand.u32 127, %v189_v25  ;;  %s180_s6 = scalar_lea.vmem [#allocation5], %s587_s20  ;;  %s641_s7 = sshll.u32 %s837_s13, 5 }
  0x2c   : > { %s988_s29 = smov (!%p182_p9, %s588_s29), 15  ;;  %218 = vmatpush.msra.mxu0 %v199_v11  ;;  %325 = vmatpush.msra.mxu3 %v607_v12  ;;  %v606_v17 = vld [vmem:[%s906_s28 + $0x30] sm:$0xff]  ;;  %v624_v18 = vld [vmem:[%s906_s28 + $0x60] sm:$0xff]  ;;  %v631_v19 = vld [vmem:[%s906_s28 + $0x78] sm:$0xff]  ;;  %s489_s16 = scalar_lea.hbm %s976_s2, %s641_s7 }
  0x2d   : > { %s589_s30 = sshll.u32 %s988_s29, 2  ;;  %290 = vmatpush.msra.mxu2 %v600_v10  ;;  %253 = vmatpush.msra.mxu1 %v595_v15  ;;  %v630_v20 = vld [vmem:[%s906_s28 + $0x70] sm:$0xff]  ;;  %v613_v21 = vld [vmem:[%s906_s28 + $0x48] sm:$0xff]  ;;  %v619_v22 = vld [vmem:[%s906_s28 + $0x58] sm:$0xff]  ;;  %s490_s17 = sshll.u32 %s180_s6, 4  ;;  %s491_s17 = int_to_ptr.vmem [resolvable:$true] %s490_s17 }
  0x2e   : > { %s185_s5 = scalar_lea.vmem %s974_s0, %s589_s30  ;;  %219 = vmatpush.msra.mxu0 %v198_v14  ;;  %326 = vmatpush.msra.mxu3 %v606_v17  ;;  %v612_v23 = vld [vmem:[%s906_s28 + $0x40] sm:$0xff]  ;;  %v618_v24 = vld [vmem:[%s906_s28 + $0x50] sm:$0xff]  ;;  %s492_s19 = sshll.u32 %s489_s16, 4  ;;  %s493_s19 = int_to_ptr.hbm [resolvable:$true] %s492_s19 }
  0x2f   : > { %v598_v1 = vld [vmem:[%s185_s5 + $0x8] sm:$0xf]  ;;  %v191_v2 = vld [vmem:[%s185_s5] sm:$0xf]  ;;  %v622_v3 = vld [vmem:[%s185_s5 + $0x18] sm:$0xf]  ;;  %433 = vmatpush.msrb.mxu2 %v625_v13  ;;  %254 = vmatpush.msra.mxu1 %v594_v16 }
  0x30   : > { %264 = vperm.xlu0 %694, %v598_v1   ;;  %193 = vperm.xlu1 %695, %v191_v2   ;;  %v604_v4 = vld [vmem:[%s185_s5 + $0xc] sm:$0xf]  ;;  %v592_v5 = vld [vmem:[%s185_s5 + $0x4] sm:$0xf]  ;;  %v628_v6 = vld [vmem:[%s185_s5 + $0x1c] sm:$0xf] }
  0x31   : > { %408 = vperm.xlu2 %696, %v622_v3   ;;  %v610_v7 = vld [vmem:[%s185_s5 + $0x10] sm:$0xf]  ;;  %v616_v8 = vld [vmem:[%s185_s5 + $0x14] sm:$0xf]  ;;  %434 = vmatpush.msrb.mxu2 %v624_v18  ;;  %s478_s13 = scalar_lea.sflag [#allocation4], %s902_s25  ;;  %s741_s23 = sshra.s32 %s493_s19, 4  ;;  %s742_s23 = int_to_ptr.hbm [resolvable:$true] %s741_s23 }
  0x32   : > { %469 = vmatpush.msrb.mxu3 %v631_v19  ;;  %361 = vmatpush.msrb.mxu0 %v613_v21  ;;  %s743_s24 = scalar_lea.hbm %s742_s23, 32  ;;  %s747_s28 = scalar_lea.hbm %s976_s2, 64 }
  0x33   : > { %397 = vmatpush.msrb.mxu1 %v619_v22  ;;  %p744_p6 = scmp.ne.s32.totalorder %s742_s23, %s743_s24  ;;  %p748_p1 = scmp.lt.s32.totalorder %s742_s23, %s976_s2 }
  0x34   : > { %470 = vmatpush.msrb.mxu3 %v630_v20  ;;  %362 = vmatpush.msrb.mxu0 %v612_v23  ;;  %p749_p3 = scmp.lt.s32.totalorder %s747_s28, %s743_s24 }
  0x35   : > { %398 = vmatpush.msrb.mxu1 %v618_v24  ;;  %p745_p13 = pnand %p744_p6, %p866_p11 }
  0x36   : > { %p750_p4 = por %p749_p3, %p748_p1 }
  0x37   : > { %p746_p0 = pneg %p745_p13 }
  0x38   : > { %300 = vperm.xlu0 %694, %v604_v4   ;;  %228 = vperm.xlu1 %695, %v592_v5  }
  0x39   : > { %444 = vperm.xlu2 %696, %v628_v6   ;;  %p751_p7 = pnand %p750_p4, %p746_p0 }
  0x40   : > { %336 = vperm.xlu0 %694, %v610_v7   ;;  %372 = vperm.xlu1 %695, %v616_v8  }
  0x8b   : > { %v409_v32 = vpop.permute.xlu2 %408 }
  0x8c   : > { %vm410_vm3 = vcmp.eq.s32.totalorder %v409_v32, %v190_v26 }
  0x8d   : > { %v623_v35 = vsel %vm410_vm3, 1.0, %v798_v29 }
  0x93   : > { %v445_v38 = vpop.permute.xlu2 %444 }
  0x94   : > { %vm446_vm6 = vcmp.eq.s32.totalorder %v445_v38, %v190_v26 }
  0x95   : > { %v629_v43 = vsel %vm446_vm6, 1.0, %v798_v29 }
  0xa2   : > { %v265_v27 = vpop.permute.xlu0 %264  ;;  %v194_v28 = vpop.permute.xlu1 %193 }
  0xa3   : > { %vm266_vm1 = vcmp.eq.s32.totalorder %v265_v27, %v190_v26  ;;  %vm195_vm2 = vcmp.eq.s32.totalorder %v194_v28, %v190_v26 }
  0xa4   : > { %v599_v30 = vsel %vm266_vm1, 1.0, %v798_v29  ;;  %v590_v31 = vsel %vm195_vm2, 1.0, %v798_v29 }
  0xa5   : > { %602 = vmatmul.msk.f32.vlgmr.msra.gmra.mxu2 %vm200_vm0, %v599_v30  ;;  %591 = vmatmul.msk.f32.vlgmr.msra.gmra.mxu0 %vm200_vm0, %v590_v31 }
  0xaa   : > { %v301_v33 = vpop.permute.xlu0 %300  ;;  %v229_v34 = vpop.permute.xlu1 %228 }
  0xab   : > { %vm302_vm4 = vcmp.eq.s32.totalorder %v301_v33, %v190_v26  ;;  %vm230_vm5 = vcmp.eq.s32.totalorder %v229_v34, %v190_v26 }
  0xac   : > { %v605_v36 = vsel %vm302_vm4, 1.0, %v798_v29  ;;  %v593_v37 = vsel %vm230_vm5, 1.0, %v798_v29 }
  0xad   : > { %596 = vmatmul.msk.f32.vlgmr.msra.gmra.mxu1 %vm200_vm0, %v593_v37  ;;  %608 = vmatmul.msk.f32.vlgmr.msra.gmra.mxu3 %vm200_vm0, %v605_v36 }
  0xae   : > { %626 = vmatmul.msk.f32.vlgmr.msrb.gmra.mxu2 %vm200_vm0, %v623_v35 }
  0xb2   : > { %v337_v39 = vpop.permute.xlu0 %336  ;;  %v373_v40 = vpop.permute.xlu1 %372 }
  0xb3   : > { %vm338_vm7 = vcmp.eq.s32.totalorder %v337_v39, %v190_v26  ;;  %vm374_vm8 = vcmp.eq.s32.totalorder %v373_v40, %v190_v26 }
  0xb4   : > { %v611_v41 = vsel %vm338_vm7, 1.0, %v798_v29  ;;  %v617_v42 = vsel %vm374_vm8, 1.0, %v798_v29 }
  0xb5   : > { %614 = vmatmul.msk.f32.vlgmr.msrb.gmra.mxu0 %vm200_vm0, %v611_v41  ;;  %620 = vmatmul.msk.f32.vlgmr.msrb.gmra.mxu1 %vm200_vm0, %v617_v42 }
  0xb6   : > { %632 = vmatmul.msk.f32.vlgmr.msrb.gmra.mxu3 %vm200_vm0, %v629_v43 }
 0x122   : > { %v221_v44 = vpop.f32.mrf.mxu0 }
 0x123   : > { %224 = vst [vmem:[%s180_s6] sm:$0xf] %v221_v44 }
 0x128   : > { %v292_v45 = vpop.f32.mrf.mxu2 }
 0x129   : > { %603 = vst [vmem:[%s180_s6 + $0x8] sm:$0xf] %v292_v45 }
 0x12a   : > { %v256_v46 = vpop.f32.mrf.mxu1 }
 0x12b   : > { %597 = vst [vmem:[%s180_s6 + $0x4] sm:$0xf] %v256_v46 }
 0x130   : > { %v328_v47 = vpop.f32.mrf.mxu3 }
 0x131   : > { %609 = vst [vmem:[%s180_s6 + $0xc] sm:$0xf] %v328_v47  ;;  %v436_v48 = vpop.f32.mrf.mxu2 }
 0x132   : > { %627 = vst [vmem:[%s180_s6 + $0x18] sm:$0xf] %v436_v48  ;;  %v364_v49 = vpop.f32.mrf.mxu0  ;;  %v400_v50 = vpop.f32.mrf.mxu1 }
 0x133   : > { %615 = vst [vmem:[%s180_s6 + $0x10] sm:$0xf] %v364_v49 }
 0x134   : > { %621 = vst [vmem:[%s180_s6 + $0x14] sm:$0xf] %v400_v50 }
 0x139   : > { %v472_v51 = vpop.f32.mrf.mxu3 }
 0x13a   : > { %633 = vst [vmem:[%s180_s6 + $0x1c] sm:$0xf] %v472_v51 }
 0x13b   : > { %754 = shalt.err (!%p751_p7)
}
 0x13c   : > { %s799_s25 = smov 64   ;;  %s800_s3 = smov 4  }
 0x13d   : > { %644 = dma.vmem_to_hbm [thread:$0]  (%p866_p11), %s491_s17, 512, %s493_s19, %s478_s13, %s799_s25, %s799_s25, %s800_s3  }
 0x13e PF: > { %s507_s4 = sand.u32 1, %s781_s9   ;;  %p982_p5 = scmp.ge.s32.totalorder %s793_s12, 2 }
 0x13f   : > { %s508_s5 = scalar_lea.sflag [#allocation4], %s507_s4 }
 0x140   : > { %p651_p8 = pnand %p982_p5, %p870_p12 }
 0x142   : > { %p652_p10 = pneg %p651_p8 }
 0x144   : > { %776 = dma.done.wait (%p652_p10), %s508_s5, 512  }
 0x145   : > { %778 = vsyncadd (%p652_p10), %s508_s5, 4294966784  ;;  %p15_p2 = scmp.ge.s32.totalorder %s841_s15, 4   ;;  %s983_s9 = smov %s785_s10 }
 0x146   : > { %s984_s10 = smov %s789_s11  ;;  %s985_s11 = smov %s853_s18 }
 0x147   : > { %s986_s12 = smov %s841_s15  ;;  %17 = sbr.rel (!%p15_p2) target bundleno = 5 (0x5), region = 97 }
 0x14c   :  { %514 = vsyncpa [#allocation3], 1 }
 0x14d   :  { %516 = vsyncpa [#allocation3 + $0x1], 1 }
 0x14e   :  { %517 = vsyncpa [#allocation4], 1 }
 0x14f   :  { %519 = vsyncpa [#allocation4 + $0x1], 1 }

</bundles_post_ra>
